<compile_context>
chip_gen: v6e
topology: v6e:2x2x1
jax: 0.10.0
libtpu: 0.0.40
codegen_flags: <defaults>
</compile_context>

<pallas_src>
from functools import partial

import jax
import jax.numpy as jnp
from jax import lax
from jax.experimental import pallas as pl
from jax.experimental.pallas import tpu as pltpu


def _round_up(x, m):
    return ((x + m - 1) // m) * m


def _conv_stats_kernel(xs_ref, w_ref, stats_ref, acc_ref):
    """Pass 1: K-tiled MXU matmul -> per-(M,N)-tile partial BN statistics only.

    No ragged-row mask: zero-padded M rows and zero K-padding contribute exactly zero to
    both sum and sum-of-squares because no bias is added inside the kernel.
    """
    k = pl.program_id(2)

    @pl.when(k == 0)
    def _():
        acc_ref[...] = jnp.zeros_like(acc_ref)

    acc_ref[...] += jnp.dot(xs_ref[...], w_ref[...],
                            preferred_element_type=jnp.float32)

    @pl.when(k == pl.num_programs(2) - 1)
    def _():
        acc = acc_ref[...]
        # Two direct lane-dense stores (no concat / relayout copy).
        stats_ref[0, 0:1, :] = jnp.sum(acc, axis=0, keepdims=True)        # sum(x)
        stats_ref[0, 1:2, :] = jnp.sum(acc * acc, axis=0, keepdims=True)  # sum(x^2)


def _conv_bn_lrelu_kernel(xs_ref, w_ref, scale_ref, shift_ref, o_ref, acc_ref, *, slope):
    """Pass 2: recompute conv matmul (no HBM conv intermediate) + BN + LeakyReLU."""
    k = pl.program_id(2)

    @pl.when(k == 0)
    def _():
        acc_ref[...] = jnp.zeros_like(acc_ref)

    acc_ref[...] += jnp.dot(xs_ref[...], w_ref[...],
                            preferred_element_type=jnp.float32)

    @pl.when(k == pl.num_programs(2) - 1)
    def _():
        y = acc_ref[...] * scale_ref[...] + shift_ref[...]
        o_ref[...] = jnp.where(y >= 0, y, slope * y)


def conv_block_forward(x_nchw, w9, bias, gamma, beta, *, stride,
                       kernel_size=3, padding=1, eps=1e-5, slope=0.2,
                       tile_m=1024, tile_n=128, tile_k=512):
    """Pallas implementation of ConvolutionalBlock.forward (training-mode BN)."""
    del bias  # Training-mode BN subtracts the batch mean, which exactly cancels a
              # constant per-channel conv bias -> fold it away (one fewer VPU pass).
              # (Only valid for batch statistics; re-add the bias for eval-mode BN.)

    N, Cin, H, W = x_nchw.shape
    Cout = w9.shape[-1]
    Hout = (H + 2 * padding - kernel_size) // stride + 1
    Wout = (W + 2 * padding - kernel_size) // stride + 1
    M = N * Hout * Wout
    K9 = kernel_size * kernel_size * Cin

    # ---- tiling choices -------------------------------------------------------------
    tile_m = max(16, min(tile_m, _round_up(M, 16)))
    tile_m = _round_up(tile_m, 16)
    num_m = pl.cdiv(M, tile_m)
    M_pad = num_m * tile_m

    tile_n = max(128, (min(tile_n, _round_up(Cout, 128)) // 128) * 128)
    Cpad = _round_up(Cout, tile_n)            # lane-dense, tile_n-divisible channel axis
    num_n = Cpad // tile_n

    if K9 <= tile_k:                          # small contraction: single full-K block
        tile_k = K9
        K9_pad, num_k = K9, 1
    else:                                     # large Cin: K-tiled weight (v7x VMEM)
        tile_k = max(128, (tile_k // 128) * 128)
        K9_pad = _round_up(K9, tile_k)
        num_k = K9_pad // tile_k

    # ---- host-side glue: NCHW -> NHWC, pad, im2col folded into the K axis (bf16) -----
    # TODO(synk): generate the 9 taps on-chip from the padded NHWC tensor (halo-block
    # DMA) to cut HBM read traffic ~9x; kept host-side here for lowering robustness.
    x = jnp.transpose(x_nchw, (0, 2, 3, 1))
    x = jnp.pad(x, ((0, 0), (padding, padding), (padding, padding), (0, 0)))
    taps = []
    for kh in range(kernel_size):
        for kw in range(kernel_size):
            sl = x[:, kh: kh + stride * (Hout - 1) + 1: stride,
                      kw: kw + stride * (Wout - 1) + 1: stride, :]
            taps.append(sl.reshape(M, Cin))
    xs = jnp.concatenate(taps, axis=1).astype(jnp.bfloat16)        # [M, 9*Cin]
    xs = jnp.pad(xs, ((0, M_pad - M), (0, K9_pad - K9)))           # zero pads only

    w_flat = w9.reshape(K9, Cout).astype(jnp.bfloat16)
    w_flat = jnp.pad(w_flat, ((0, K9_pad - K9), (0, Cpad - Cout)))

    cparams = pltpu.CompilerParams(
        dimension_semantics=("parallel", "parallel", "arbitrary"),
        vmem_limit_bytes=48 * 1024 * 1024)    # explicit, below v7x's 64 MiB physical

    mm_flops = 2 * M_pad * K9_pad * Cpad
    xs_bytes = M_pad * K9_pad * 2
    w_bytes = K9_pad * Cpad * 2
    stats_bytes = num_m * 2 * Cpad * 4
    out_bytes = M_pad * Cpad * 4

    # ---- pass 1: conv matmul -> per-tile partial BN statistics (no conv writeback) ---
    part_stats = pl.pallas_call(
        _conv_stats_kernel,
        grid=(num_m, num_n, num_k),
        in_specs=[pl.BlockSpec((tile_m, tile_k), lambda i, j, k: (i, k)),
                  pl.BlockSpec((tile_k, tile_n), lambda i, j, k: (k, j))],
        out_specs=pl.BlockSpec((1, 2, tile_n), lambda i, j, k: (i, 0, j)),
        out_shape=jax.ShapeDtypeStruct((num_m, 2, Cpad), jnp.float32),
        scratch_shapes=[pltpu.VMEM((tile_m, tile_n), jnp.float32)],
        compiler_params=cparams,
        cost_estimate=pl.CostEstimate(flops=mm_flops, transcendentals=0,
                                      bytes_accessed=xs_bytes + w_bytes + stats_bytes),
    )(xs, w_flat)

    # ---- tiny host reduction: batch statistics -> fused scale / shift ----------------
    totals = jnp.sum(part_stats, axis=0)                      # [2, Cpad]
    mean = totals[0] / M
    # NOTE: E[x^2] - E[x]^2 in f32 is cancellation-prone when |mean| >> std; acceptable
    # here (no bias in-kernel, centered activations).  TODO(synk): shifted/Welford stats.
    var = jnp.maximum(totals[1] / M - mean * mean, 0.0)       # biased (training-mode BN)
    gamma_p = jnp.pad(gamma.astype(jnp.float32), (0, Cpad - Cout))
    beta_p = jnp.pad(beta.astype(jnp.float32), (0, Cpad - Cout))
    scale = (gamma_p * lax.rsqrt(var + eps)).reshape(1, Cpad)
    shift = (beta_p - mean * scale[0]).reshape(1, Cpad)

    # ---- pass 2: recompute conv + normalize + LeakyReLU -------------------------------
    out = pl.pallas_call(
        partial(_conv_bn_lrelu_kernel, slope=slope),
        grid=(num_m, num_n, num_k),
        in_specs=[pl.BlockSpec((tile_m, tile_k), lambda i, j, k: (i, k)),
                  pl.BlockSpec((tile_k, tile_n), lambda i, j, k: (k, j)),
                  pl.BlockSpec((1, tile_n), lambda i, j, k: (0, j)),
                  pl.BlockSpec((1, tile_n), lambda i, j, k: (0, j))],
        out_specs=pl.BlockSpec((tile_m, tile_n), lambda i, j, k: (i, j)),
        out_shape=jax.ShapeDtypeStruct((M_pad, Cpad), jnp.float32),
        scratch_shapes=[pltpu.VMEM((tile_m, tile_n), jnp.float32)],
        compiler_params=cparams,
        cost_estimate=pl.CostEstimate(
            flops=mm_flops + 3 * M_pad * Cpad, transcendentals=0,
            bytes_accessed=xs_bytes + w_bytes + out_bytes + 4 * 2 * Cpad),
    )(xs, w_flat, scale, shift)

    out = out[:M, :Cout].reshape(N, Hout, Wout, Cout)
    return jnp.transpose(out, (0, 3, 1, 2))                   # back to NCHW


def conv_block_reference(x_nchw, w9, bias, gamma, beta, *, stride,
                         kernel_size=3, padding=1, eps=1e-5, slope=0.2):
    """Pure-JAX reference mirroring PyTorch Conv2d+BN(train)+LeakyReLU.

    Inputs/weights are rounded to bf16 (the kernel's storage dtype) so the check isolates
    kernel correctness from the intentional bf16 quantization; accumulation and everything
    downstream stays f32.  The conv bias is included here (BN cancels it), which
    validates the kernel's bias fold.
    """
    Cin = x_nchw.shape[1]
    Cout = w9.shape[-1]
    w_hwio = w9.reshape(kernel_size, kernel_size, Cin, Cout)
    x = jnp.transpose(x_nchw, (0, 2, 3, 1)).astype(jnp.bfloat16).astype(jnp.float32)
    w_hwio = w_hwio.astype(jnp.bfloat16).astype(jnp.float32)
    y = lax.conv_general_dilated(
        x, w_hwio, window_strides=(stride, stride),
        padding=((padding, padding), (padding, padding)),
        dimension_numbers=('NHWC', 'HWIO', 'NHWC'))
    y = y + bias
    mean = jnp.mean(y, axis=(0, 1, 2))
    var = jnp.mean(jnp.square(y - mean), axis=(0, 1, 2))
    y = (y - mean) * lax.rsqrt(var + eps)
    y = y * gamma + beta
    y = jnp.where(y >= 0, y, slope * y)
    return jnp.transpose(y, (0, 3, 1, 2))


if __name__ == "__main__":
    def check(x, w9, bias, gamma, beta, *, stride, tag, **kw):
        out = conv_block_forward(x, w9, bias, gamma, beta, stride=stride, **kw)
        out = jax.block_until_ready(out)
        ref = conv_block_reference(x, w9, bias, gamma, beta, stride=stride)
        good = bool(jnp.allclose(out, ref, rtol=2e-3, atol=2e-3))
        if not good:
            print(f"mismatch [{tag}]: max abs err = "
                  f"{float(jnp.max(jnp.abs(out - ref)))}")
        return good

    ok = True

    # Cases A/B/C: Conv2d(4 -> 8, 3x3, pad=1) on NCHW [2, 4, 16, 16];
    # exercise stride 1/2 and a 4-tile M grid with cross-tile partial-stat reduction.
    k1, k2, k3, k4, k5 = jax.random.split(jax.random.PRNGKey(0), 5)
    N, Cin, H, W, Cout = 2, 4, 16, 16, 8
    x = jax.random.normal(k1, (N, Cin, H, W), jnp.float32)
    w9 = 0.2 * jax.random.normal(k2, (9, Cin, Cout), jnp.float32)   # conv weight, tap-major
    bias = 0.1 * jax.random.normal(k3, (Cout,), jnp.float32)        # conv bias (folded)
    gamma = 1.0 + 0.1 * jax.random.normal(k4, (Cout,), jnp.float32) # BN weight
    beta = 0.1 * jax.random.normal(k5, (Cout,), jnp.float32)        # BN bias

    ok &= check(x, w9, bias, gamma, beta, stride=1, tag="stride1")
    ok &= check(x, w9, bias, gamma, beta, stride=2, tag="stride2")
    ok &= check(x, w9, bias, gamma, beta, stride=1, tile_m=128, tag="stride1/4-M-tiles")

    # Case D: Conv2d(16 -> 256) exercises the K-accumulation path (num_k=2 with zero
    # K-padding) and the N-tiled weight/output path (num_n=2) on a 4-tile M grid.
    k1, k2, k3, k4, k5 = jax.random.split(jax.random.PRNGKey(1), 5)
    Cin2, Cout2 = 16, 256
    x2 = jax.random.normal(k1, (N, Cin2, H, W), jnp.float32)
    w92 = 0.1 * jax.random.normal(k2, (9, Cin2, Cout2), jnp.float32)
    bias2 = 0.1 * jax.random.normal(k3, (Cout2,), jnp.float32)
    gamma2 = 1.0 + 0.1 * jax.random.normal(k4, (Cout2,), jnp.float32)
    beta2 = 0.1 * jax.random.normal(k5, (Cout2,), jnp.float32)
    ok &= check(x2, w92, bias2, gamma2, beta2, stride=1, tile_m=128, tile_k=128,
                tag="Cin16/Cout256/K-N-tiles")

    if ok:
        print("KERNEL_OK")
</pallas_src>

<mosaic_0001>
module attributes {stable_mosaic.version = 11 : i64} {
  func.func @_conv_stats_kernel(%arg0: i32, %arg1: i32, %arg2: i32, %arg3: memref<512x36xbf16, #tpu.memory_space<vmem>>, %arg4: memref<36x128xbf16, #tpu.memory_space<vmem>>, %arg5: memref<1x2x128xf32, #tpu.memory_space<vmem>>, %arg6: memref<512x128xf32, #tpu.memory_space<vmem>>) attributes {dimension_semantics = [#tpu.dimension_semantics<parallel>, #tpu.dimension_semantics<parallel>, #tpu.dimension_semantics<arbitrary>], iteration_bounds = array<i64: 1, 1, 1>, scalar_prefetch = 0 : i64, scratch_operands = 1 : i64, tpu.core_type = #tpu.core_type<tc>, window_params = [{transform_indices = @transform_0, window_bounds = array<i64: 512, 36>}, {transform_indices = @transform_1, window_bounds = array<i64: 36, 128>}, {transform_indices = @transform_2, window_bounds = array<i64: 1, 2, 128>}]} {
    %c0_i32 = arith.constant 0 : i32
    %0 = arith.cmpi eq, %arg2, %c0_i32 : i32
    %1 = arith.extui %0 : i1 to i32
    %c0_i32_0 = arith.constant 0 : i32
    %2 = arith.cmpi ne, %1, %c0_i32_0 : i32
    scf.if %2 {
      %cst_10 = arith.constant 0.000000e+00 : f32
      %12 = vector.broadcast %cst_10 : f32 to vector<512x128xf32>
      %c0_11 = arith.constant 0 : index
      %c0_12 = arith.constant 0 : index
      %13 = vector.load %arg6[%c0_11, %c0_12] : memref<512x128xf32, #tpu.memory_space<vmem>>, vector<512x128xf32>
      tpu.vector_store %arg6[%c0_11, %c0_12], %12 {strides = array<i32>} : memref<512x128xf32, #tpu.memory_space<vmem>>, vector<512x128xf32>,
    } else {
    }
    %c0 = arith.constant 0 : index
    %c0_1 = arith.constant 0 : index
    %3 = vector.load %arg6[%c0, %c0_1] : memref<512x128xf32, #tpu.memory_space<vmem>>, vector<512x128xf32>
    %c0_2 = arith.constant 0 : index
    %c0_3 = arith.constant 0 : index
    %4 = vector.load %arg3[%c0_2, %c0_3] : memref<512x36xbf16, #tpu.memory_space<vmem>>, vector<512x36xbf16>
    %c0_4 = arith.constant 0 : index
    %c0_5 = arith.constant 0 : index
    %5 = vector.load %arg4[%c0_4, %c0_5] : memref<36x128xbf16, #tpu.memory_space<vmem>>, vector<36x128xbf16>
    %cst = arith.constant dense<0.000000e+00> : vector<512x128xf32>
    %6 = tpu.matmul %4, %5, %cst {dimension_numbers = #tpu.dot_dimension_numbers<[1], [0], [0], [1], [0, 0, 1, 1], [], []>} : vector<512x36xbf16>, vector<36x128xbf16>, vector<512x128xf32> -> vector<512x128xf32>
    %7 = arith.addf %3, %6 : vector<512x128xf32>
    %c0_6 = arith.constant 0 : index
    %c0_7 = arith.constant 0 : index
    %8 = vector.load %arg6[%c0_6, %c0_7] : memref<512x128xf32, #tpu.memory_space<vmem>>, vector<512x128xf32>
    tpu.vector_store %arg6[%c0_6, %c0_7], %7 {strides = array<i32>} : memref<512x128xf32, #tpu.memory_space<vmem>>, vector<512x128xf32>,
    %c0_i32_8 = arith.constant 0 : i32
    %9 = arith.cmpi eq, %arg2, %c0_i32_8 : i32
    %10 = arith.extui %9 : i1 to i32
    %c0_i32_9 = arith.constant 0 : i32
    %11 = arith.cmpi ne, %10, %c0_i32_9 : i32
    scf.if %11 {
      %c0_10 = arith.constant 0 : index
      %c0_11 = arith.constant 0 : index
      %12 = vector.load %arg6[%c0_10, %c0_11] : memref<512x128xf32, #tpu.memory_space<vmem>>, vector<512x128xf32>
      %cst_12 = arith.constant dense<0.000000e+00> : vector<128xf32>
      %13 = vector.multi_reduction <add>, %12, %cst_12 [0] : vector<512x128xf32> to vector<128xf32>
      %14 = vector.shape_cast %13 : vector<128xf32> to vector<1x128xf32>
      %c0_13 = arith.constant 0 : index
      %c0_14 = arith.constant 0 : index
      %c0_15 = arith.constant 0 : index
      %15 = vector.load %arg5[%c0_13, %c0_14, %c0_15] : memref<1x2x128xf32, #tpu.memory_space<vmem>>, vector<1x1x128xf32>
      %16 = vector.shape_cast %15 : vector<1x1x128xf32> to vector<1x128xf32>
      %17 = vector.shape_cast %14 : vector<1x128xf32> to vector<1x1x128xf32>
      tpu.vector_store %arg5[%c0_13, %c0_14, %c0_15], %17 {strides = array<i32>} : memref<1x2x128xf32, #tpu.memory_space<vmem>>, vector<1x1x128xf32>,
      %18 = arith.mulf %12, %12 : vector<512x128xf32>
      %cst_16 = arith.constant dense<0.000000e+00> : vector<128xf32>
      %19 = vector.multi_reduction <add>, %18, %cst_16 [0] : vector<512x128xf32> to vector<128xf32>
      %20 = vector.shape_cast %19 : vector<128xf32> to vector<1x128xf32>
      %c0_17 = arith.constant 0 : index
      %c1 = arith.constant 1 : index
      %c0_18 = arith.constant 0 : index
      %21 = vector.load %arg5[%c0_17, %c1, %c0_18] : memref<1x2x128xf32, #tpu.memory_space<vmem>>, vector<1x1x128xf32>
      %22 = vector.shape_cast %21 : vector<1x1x128xf32> to vector<1x128xf32>
      %23 = vector.shape_cast %20 : vector<1x128xf32> to vector<1x1x128xf32>
      tpu.vector_store %arg5[%c0_17, %c1, %c0_18], %23 {strides = array<i32>} : memref<1x2x128xf32, #tpu.memory_space<vmem>>, vector<1x1x128xf32>,
    } else {
    }
    return
  }
  func.func @transform_0(%arg0: i32, %arg1: i32, %arg2: i32) -> (i32, i32) {
    %c0_i32 = arith.constant 0 : i32
    return %arg0, %arg2 : i32, i32
  }
  func.func @transform_1(%arg0: i32, %arg1: i32, %arg2: i32) -> (i32, i32) {
    %c0_i32 = arith.constant 0 : i32
    return %arg2, %arg1 : i32, i32
  }
  func.func @transform_2(%arg0: i32, %arg1: i32, %arg2: i32) -> (i32, i32, i32) {
    %c0_i32 = arith.constant 0 : i32
    %c0_i32_0 = arith.constant 0 : i32
    return %arg0, %c0_i32, %arg1 : i32, i32, i32
  }
}

</mosaic_0001>

<bundles_post_ra>
// kernel: tpu_custom_call.1
= control target key start
LH: loop header
LB: loop body
LE: loop exit
PB: predicated region body
PF: predicated region fallthrough
CT: control target
= control target key end

     0   :  { %vm486_vm0 = vcmask 1041408   ;;  %vm389_vm1 = vcmask 293888   ;;  %s1666_s0 = inlined_call_operand.vmem [shape: bf16[512,36], index: 0, kind: input, shape index: {}]   ;;  %s1667_s1 = inlined_call_operand.vmem [shape: bf16[36,128], index: 1, kind: input, shape index: {}]   ;;  %s1668_s2 = inlined_call_operand.hbm [shape: f32[1,2,128], index: 2, kind: output, shape index: {}]  }
   0x1   :  { %v1373_v0 = vld [vmem:[%s1667_s1 + $0x10] ss:$0 sps:$4 sm:$0x33]   ;;  %v1374_v1 = vld [vmem:[%s1667_s1 + $0x8] sm:$0xff]   ;;  %v1376_v3 = vld [vmem:[%s1666_s0] sm:$0xff]  }
   0x2   :  { %1370 = vmatprep.subr.msk.bf16.mxu0 %vm486_vm0, %v1373_v0  ;;  %v488_v2 = vsel %vm486_vm0, %v1373_v0, 0  ;;  %1371 = vmatprep.subr.msk.bf16.mxu1 %vm486_vm0, %v1373_v0  ;;  %v1375_v4 = vld [vmem:[%s1667_s1] sm:$0xff]   ;;  %v1377_v5 = vld [vmem:[%s1666_s0 + $0x8] sm:$0xff]   ;;  %v1378_v6 = vld [vmem:[%s1666_s0 + $0x10] sm:$0xff]  }
   0x3   :  { %1295 = vmatpush3.bf16.msra.mxu0 %v488_v2  ;;  %1367 = vmatpush3.bf16.msra.mxu1 %v488_v2  ;;  %v1379_v7 = vld [vmem:[%s1666_s0 + $0x18] sm:$0xff]   ;;  %v1380_v8 = vld [vmem:[%s1666_s0 + $0x20] sm:$0xff]   ;;  %v1393_v10 = vld [vmem:[%s1666_s0 + $0x88] sm:$0xff]  }
   0x4   :  { %1296 = vmatprep.subr.bf16.mxu0 %v1374_v1  ;;  %1365 = vmatprep.subr.bf16.mxu1 %v1374_v1  ;;  %v1392_v9 = vld [vmem:[%s1666_s0 + $0x80] sm:$0xff]   ;;  %v1394_v11 = vld [vmem:[%s1666_s0 + $0x90] sm:$0xff]   ;;  %v1381_v12 = vld [vmem:[%s1666_s0 + $0x28] sm:$0xff]  }
   0x5   :  { %1300 = vmatprep.mubr.msk.bf16.mxu0 %vm389_vm1, %v1376_v3  ;;  %1332 = vmatprep.mubr.msk.bf16.mxu1 %vm389_vm1, %v1392_v9  ;;  %v1382_v13 = vld [vmem:[%s1666_s0 + $0x30] sm:$0xff]   ;;  %v1395_v14 = vld [vmem:[%s1666_s0 + $0x98] sm:$0xff]   ;;  %v1396_v15 = vld [vmem:[%s1666_s0 + $0xa0] sm:$0xff]  }
   0x6   :  { %v1383_v16 = vld [vmem:[%s1666_s0 + $0x38] sm:$0xff]   ;;  %v1397_v17 = vld [vmem:[%s1666_s0 + $0xa8] sm:$0xff]   ;;  %v1384_v18 = vld [vmem:[%s1666_s0 + $0x40] sm:$0xff]  }
   0x7   :  { %1297 = vmatpush3.bf16.msra.mxu0 %v1374_v1  ;;  %1368 = vmatpush3.bf16.msra.mxu1 %v1374_v1  ;;  %v1398_v19 = vld [vmem:[%s1666_s0 + $0xb0] sm:$0xff]  }
   0x8   :  { %1298 = vmatprep.subr.bf16.mxu0 %v1375_v4  ;;  %1366 = vmatprep.subr.bf16.mxu1 %v1375_v4 }
   0xb   :  { %1299 = vmatpush3.bf16.msra.mxu0 %v1375_v4  ;;  %1369 = vmatpush3.bf16.msra.mxu1 %v1375_v4 }
   0xe   :  { %1301 = vmatmul.mubr.msk.bf16.vlgmr.msra.gmra.mxu0 %vm389_vm1, %v1377_v5  ;;  %1333 = vmatmul.mubr.msk.bf16.vlgmr.msra.gmra.mxu1 %vm389_vm1, %v1393_v10 }
   0xf   :  { %1304 = vmatprep.mubr.msk.bf16.mxu0 %vm389_vm1, %v1378_v6  ;;  %1336 = vmatprep.mubr.msk.bf16.mxu1 %vm389_vm1, %v1394_v11 }
  0x16   :  { %1305 = vmatmul.mubr.msk.bf16.gmra.mxu0 %vm389_vm1, %v1379_v7  ;;  %1337 = vmatmul.mubr.msk.bf16.gmra.mxu1 %vm389_vm1, %v1395_v14 }
  0x17   :  { %1308 = vmatprep.mubr.msk.bf16.mxu0 %vm389_vm1, %v1380_v8  ;;  %1340 = vmatprep.mubr.msk.bf16.mxu1 %vm389_vm1, %v1396_v15 }
  0x1e   :  { %1309 = vmatmul.mubr.msk.bf16.gmra.mxu0 %vm389_vm1, %v1381_v12 }
  0x1f   :  { %1312 = vmatprep.mubr.msk.bf16.mxu0 %vm389_vm1, %v1382_v13 }
  0x20   :  { %7 = vsyncpa [#allocation4], 0  ;;  %1341 = vmatmul.mubr.msk.bf16.gmra.mxu1 %vm389_vm1, %v1397_v17  ;;  %v1385_v20 = vld [vmem:[%s1666_s0 + $0x48] sm:$0xff]   ;;  %v1399_v21 = vld [vmem:[%s1666_s0 + $0xb8] sm:$0xff]  }
  0x21   :  { %1344 = vmatprep.mubr.msk.bf16.mxu1 %vm389_vm1, %v1398_v19  ;;  %v1386_v22 = vld [vmem:[%s1666_s0 + $0x50] sm:$0xff]   ;;  %v1400_v23 = vld [vmem:[%s1666_s0 + $0xc0] sm:$0xff]   ;;  %v1387_v24 = vld [vmem:[%s1666_s0 + $0x58] sm:$0xff]  }
  0x22   :  { %v1401_v25 = vld [vmem:[%s1666_s0 + $0xc8] sm:$0xff]   ;;  %v1388_v26 = vld [vmem:[%s1666_s0 + $0x60] sm:$0xff]   ;;  %v1402_v27 = vld [vmem:[%s1666_s0 + $0xd0] sm:$0xff]  }
  0x23   :  { %v1389_v28 = vld [vmem:[%s1666_s0 + $0x68] sm:$0xff]   ;;  %v1403_v29 = vld [vmem:[%s1666_s0 + $0xd8] sm:$0xff]   ;;  %v1390_v30 = vld [vmem:[%s1666_s0 + $0x70] sm:$0xff]  }
  0x24   :  { %v1404_v31 = vld [vmem:[%s1666_s0 + $0xe0] sm:$0xff]   ;;  %v1391_v32 = vld [vmem:[%s1666_s0 + $0x78] sm:$0xff]   ;;  %v1405_v33 = vld [vmem:[%s1666_s0 + $0xe8] sm:$0xff]  }
  0x25   :  { %v1406_v34 = vld [vmem:[%s1666_s0 + $0xf0] sm:$0xff]   ;;  %v1407_v35 = vld [vmem:[%s1666_s0 + $0xf8] sm:$0xff]   ;;  %s1430_s0 = smov [#allocation3]  }
  0x26   :  { %1313 = vmatmul.mubr.msk.bf16.gmra.mxu0 %vm389_vm1, %v1383_v16  ;;  %s1184_s1 = sshll.u32 %s1430_s0, 4  ;;  %s1185_s1 = int_to_ptr.vmem [resolvable:$true] %s1184_s1 }
  0x27   :  { %1316 = vmatprep.mubr.msk.bf16.mxu0 %vm389_vm1, %v1384_v18  ;;  %s1408_s21 = scalar_lea.vmem %s1185_s1, 32  ;;  %p1413_p1 = scmp.lt.s32.totalorder %s1185_s1, %s1185_s1 }
  0x28   :  { %1345 = vmatmul.mubr.msk.bf16.gmra.mxu1 %vm389_vm1, %v1399_v21  ;;  %p1409_p0 = scmp.ne.s32.totalorder %s1185_s1, %s1408_s21  ;;  %p1414_p2 = scmp.lt.s32.totalorder %s1408_s21, %s1408_s21 }
  0x29   :  { %1348 = vmatprep.mubr.msk.bf16.mxu1 %vm389_vm1, %v1400_v23 }
  0x2a   :  { %p1415_p3 = por %p1414_p2, %p1413_p1 }
  0x2c   :  { %p1416_p4 = pnand %p1415_p3, %p1409_p0 }
  0x2e   :  { %1317 = vmatmul.mubr.msk.bf16.gmra.mxu0 %vm389_vm1, %v1385_v20 }
  0x2f   :  { %1320 = vmatprep.mubr.msk.bf16.mxu0 %vm389_vm1, %v1386_v22 }
  0x30   :  { %1349 = vmatmul.mubr.msk.bf16.gmra.mxu1 %vm389_vm1, %v1401_v25 }
  0x31   :  { %1352 = vmatprep.mubr.msk.bf16.mxu1 %vm389_vm1, %v1402_v27 }
  0x36   :  { %1321 = vmatmul.mubr.msk.bf16.gmra.mxu0 %vm389_vm1, %v1387_v24 }
  0x37   :  { %1324 = vmatprep.mubr.msk.bf16.mxu0 %vm389_vm1, %v1388_v26 }
  0x38   :  { %1353 = vmatmul.mubr.msk.bf16.gmra.mxu1 %vm389_vm1, %v1403_v29 }
  0x39   :  { %1356 = vmatprep.mubr.msk.bf16.mxu1 %vm389_vm1, %v1404_v31 }
  0x3e   :  { %1325 = vmatmul.mubr.msk.bf16.gmra.mxu0 %vm389_vm1, %v1389_v28 }
  0x3f   :  { %1328 = vmatprep.mubr.msk.bf16.mxu0 %vm389_vm1, %v1390_v30 }
  0x40   :  { %1357 = vmatmul.mubr.msk.bf16.gmra.mxu1 %vm389_vm1, %v1405_v33 }
  0x41   :  { %1360 = vmatprep.mubr.msk.bf16.mxu1 %vm389_vm1, %v1406_v34 }
  0x46   :  { %1329 = vmatmul.mubr.msk.bf16.gmra.mxu0 %vm389_vm1, %v1391_v32 }
  0x48   :  { %1361 = vmatmul.mubr.msk.bf16.gmra.mxu1 %vm389_vm1, %v1407_v35 }
  0xce   :  { %v1302_v36 = vpop.f32.mrf.mxu0  ;;  %v1583_v44 = vpop.f32.mrf.mxu1 }
  0xcf   :  { %v1046_v45 = vmul.f32 %v1302_v36, %v1302_v36 }
  0xd0   :  { %v524_v37 = vpop.f32.mrf.mxu0  ;;  %v1585_v49 = vpop.f32.mrf.mxu1 }
  0xd1   :  { %v1044_v40 = vmul.f32 %v524_v37, %v524_v37 }
  0xd2   :  { %v1303_v38 = vpop.f32.mrf.mxu0  ;;  %v1587_v54 = vpop.f32.mrf.mxu1 }
  0xd3   :  { %v1047_v50 = vmul.f32 %v1303_v38, %v1303_v38 }
  0xd4   :  { %v527_v39 = vpop.f32.mrf.mxu0  ;;  %v1589_v59 = vpop.f32.mrf.mxu1 }
  0xd5   :  { %v974_v41 = vadd.f32 %v527_v39, %v524_v37  ;;  %v1045_v42 = vmul.f32 %v527_v39, %v527_v39 }
  0xd6   :  { %v1306_v43 = vpop.f32.mrf.mxu0  ;;  %v1591_v0 = vpop.f32.mrf.mxu1 }
  0xd7   :  { %v975_v46 = vadd.f32 %v1302_v36, %v974_v41  ;;  %v1108_v47 = vadd.f32 %v1045_v42, %v1044_v40  ;;  %v1050_v1 = vmul.f32 %v1306_v43, %v1306_v43 }
  0xd8   :  { %v540_v48 = vpop.f32.mrf.mxu0  ;;  %v1593_v9 = vpop.f32.mrf.mxu1 }
  0xd9   :  { %v1109_v51 = vadd.f32 %v1108_v47, %v1046_v45  ;;  %v976_v52 = vadd.f32 %v1303_v38, %v975_v46  ;;  %v1048_v56 = vmul.f32 %v540_v48, %v540_v48 }
  0xda   :  { %v1307_v53 = vpop.f32.mrf.mxu0  ;;  %v1595_v18 = vpop.f32.mrf.mxu1 }
  0xdb   :  { %v977_v55 = vadd.f32 %v976_v52, %v540_v48  ;;  %v1110_v57 = vadd.f32 %v1109_v51, %v1047_v50  ;;  %v1051_v5 = vmul.f32 %v1307_v53, %v1307_v53 }
  0xdc   :  { %v543_v58 = vpop.f32.mrf.mxu0  ;;  %v1597_v27 = vpop.f32.mrf.mxu1 }
  0xdd   :  { %v1111_v60 = vadd.f32 %v1110_v57, %v1048_v56  ;;  %v978_v61 = vadd.f32 %v977_v55, %v543_v58  ;;  %v1049_v62 = vmul.f32 %v543_v58, %v543_v58 }
  0xde   :  { %v1310_v63 = vpop.f32.mrf.mxu0 }
  0xdf   :  { %v979_v2 = vadd.f32 %v1306_v43, %v978_v61  ;;  %v1112_v3 = vadd.f32 %v1111_v60, %v1049_v62  ;;  %v1054_v19 = vmul.f32 %v1310_v63, %v1310_v63 }
  0xe0   :  { %v556_v4 = vpop.f32.mrf.mxu0  ;;  %v1599_v36 = vpop.f32.mrf.mxu1 }
  0xe1   :  { %v1113_v6 = vadd.f32 %v1112_v3, %v1050_v1  ;;  %v980_v7 = vadd.f32 %v1307_v53, %v979_v2  ;;  %v1052_v11 = vmul.f32 %v556_v4, %v556_v4 }
  0xe2   :  { %v1311_v8 = vpop.f32.mrf.mxu0  ;;  %v1601_v46 = vpop.f32.mrf.mxu1 }
  0xe3   :  { %v981_v10 = vadd.f32 %v980_v7, %v556_v4  ;;  %v1114_v12 = vadd.f32 %v1113_v6, %v1051_v5  ;;  %v1055_v23 = vmul.f32 %v1311_v8, %v1311_v8 }
  0xe4   :  { %v559_v13 = vpop.f32.mrf.mxu0  ;;  %v1603_v57 = vpop.f32.mrf.mxu1 }
  0xe5   :  { %v1115_v14 = vadd.f32 %v1114_v12, %v1052_v11  ;;  %v982_v15 = vadd.f32 %v981_v10, %v559_v13  ;;  %v1053_v16 = vmul.f32 %v559_v13, %v559_v13 }
  0xe6   :  { %v1314_v17 = vpop.f32.mrf.mxu0  ;;  %v1605_v4 = vpop.f32.mrf.mxu1 }
  0xe7   :  { %v983_v20 = vadd.f32 %v1310_v63, %v982_v15  ;;  %v1116_v21 = vadd.f32 %v1115_v14, %v1053_v16  ;;  %v1058_v37 = vmul.f32 %v1314_v17, %v1314_v17 }
  0xe8   :  { %v572_v22 = vpop.f32.mrf.mxu0  ;;  %v1607_v14 = vpop.f32.mrf.mxu1 }
  0xe9   :  { %v1117_v24 = vadd.f32 %v1116_v21, %v1054_v19  ;;  %v984_v25 = vadd.f32 %v1311_v8, %v983_v20  ;;  %v1056_v29 = vmul.f32 %v572_v22, %v572_v22 }
  0xea   :  { %v1315_v26 = vpop.f32.mrf.mxu0 }
  0xeb   :  { %v985_v28 = vadd.f32 %v984_v25, %v572_v22  ;;  %v1118_v30 = vadd.f32 %v1117_v24, %v1055_v23  ;;  %v1059_v41 = vmul.f32 %v1315_v26, %v1315_v26  ;;  %v1609_v24 = vpop.f32.mrf.mxu1 }
  0xec   :  { %v575_v31 = vpop.f32.mrf.mxu0 }
  0xed   :  { %v1119_v32 = vadd.f32 %v1118_v30, %v1056_v29  ;;  %v986_v33 = vadd.f32 %v985_v28, %v575_v31  ;;  %v1057_v34 = vmul.f32 %v575_v31, %v575_v31 }
  0xee   :  { %v1318_v35 = vpop.f32.mrf.mxu0 }
  0xef   :  { %v987_v38 = vadd.f32 %v1314_v17, %v986_v33  ;;  %v1120_v39 = vadd.f32 %v1119_v32, %v1057_v34  ;;  %v1062_v58 = vmul.f32 %v1318_v35, %v1318_v35  ;;  %v1611_v34 = vpop.f32.mrf.mxu1 }
  0xf0   :  { %v588_v40 = vpop.f32.mrf.mxu0 }
  0xf1   :  { %v1121_v42 = vadd.f32 %v1120_v39, %v1058_v37  ;;  %v988_v43 = vadd.f32 %v1315_v26, %v987_v38  ;;  %v1060_v48 = vmul.f32 %v588_v40, %v588_v40 }
  0xf2   :  { %v1319_v45 = vpop.f32.mrf.mxu0 }
  0xf3   :  { %v989_v47 = vadd.f32 %v988_v43, %v588_v40  ;;  %v1122_v50 = vadd.f32 %v1121_v42, %v1059_v41  ;;  %v1063_v63 = vmul.f32 %v1319_v45, %v1319_v45 }
  0xf4   :  { %v591_v51 = vpop.f32.mrf.mxu0 }
  0xf5   :  { %v1123_v52 = vadd.f32 %v1122_v50, %v1060_v48  ;;  %v990_v53 = vadd.f32 %v989_v47, %v591_v51  ;;  %v1061_v55 = vmul.f32 %v591_v51, %v591_v51 }
  0xf6   :  { %v1322_v56 = vpop.f32.mrf.mxu0 }
  0xf7   :  { %v991_v60 = vadd.f32 %v1318_v35, %v990_v53  ;;  %v1124_v61 = vadd.f32 %v1123_v52, %v1061_v55  ;;  %v1066_v15 = vmul.f32 %v1322_v56, %v1322_v56 }
  0xf8   :  { %v604_v62 = vpop.f32.mrf.mxu0 }
  0xf9   :  { %v1125_v1 = vadd.f32 %v1124_v61, %v1062_v58  ;;  %v992_v2 = vadd.f32 %v1319_v45, %v991_v60  ;;  %v1064_v6 = vmul.f32 %v604_v62, %v604_v62  ;;  %v703_v45 = vpop.f32.mrf.mxu1 }
  0xfa   :  { %v1323_v3 = vpop.f32.mrf.mxu0 }
  0xfb   :  { %v993_v5 = vadd.f32 %v992_v2, %v604_v62  ;;  %v1126_v7 = vadd.f32 %v1125_v1, %v1063_v63  ;;  %v1067_v20 = vmul.f32 %v1323_v3, %v1323_v3 }
  0xfc   :  { %v607_v8 = vpop.f32.mrf.mxu0 }
  0xfd   :  { %v1127_v10 = vadd.f32 %v1126_v7, %v1064_v6  ;;  %v994_v11 = vadd.f32 %v993_v5, %v607_v8  ;;  %v1065_v12 = vmul.f32 %v607_v8, %v607_v8  ;;  %v1077_v8 = vmul.f32 %v1589_v59, %v1589_v59 }
  0xfe   :  { %v1326_v13 = vpop.f32.mrf.mxu0 }
  0xff   :  { %v995_v16 = vadd.f32 %v1322_v56, %v994_v11  ;;  %v1128_v17 = vadd.f32 %v1127_v10, %v1065_v12  ;;  %v1070_v35 = vmul.f32 %v1326_v13, %v1326_v13  ;;  %v1613_v56 = vpop.f32.mrf.mxu1  ;;  %v1078_v12 = vmul.f32 %v1583_v44, %v1583_v44 }
 0x100   :  { %v620_v19 = vpop.f32.mrf.mxu0 }
 0x101   :  { %v1129_v21 = vadd.f32 %v1128_v17, %v1066_v15  ;;  %v996_v22 = vadd.f32 %v1323_v3, %v995_v16  ;;  %v1068_v26 = vmul.f32 %v620_v19, %v620_v19  ;;  %v716_v2 = vpop.f32.mrf.mxu1  ;;  %v1076_v3 = vmul.f32 %v1585_v49, %v1585_v49 }
 0x102   :  { %v1327_v23 = vpop.f32.mrf.mxu0  ;;  %v1079_v16 = vmul.f32 %v1587_v54, %v1587_v54 }
 0x103   :  { %v997_v25 = vadd.f32 %v996_v22, %v620_v19  ;;  %v1130_v28 = vadd.f32 %v1129_v21, %v1067_v20  ;;  %v1071_v40 = vmul.f32 %v1327_v23, %v1327_v23  ;;  %v1351_v11 = vpop.f32.mrf.mxu1 }
 0x104   :  { %v623_v29 = vpop.f32.mrf.mxu0 }
 0x105   :  { %v1131_v30 = vadd.f32 %v1130_v28, %v1068_v26  ;;  %v998_v31 = vadd.f32 %v997_v25, %v623_v29  ;;  %v1069_v32 = vmul.f32 %v623_v29, %v623_v29  ;;  %v1082_v26 = vmul.f32 %v1591_v0, %v1591_v0 }
 0x106   :  { %v1330_v33 = vpop.f32.mrf.mxu0  ;;  %v1083_v29 = vmul.f32 %v1595_v18, %v1595_v18 }
 0x107   :  { %v999_v37 = vadd.f32 %v1326_v13, %v998_v31  ;;  %v1132_v38 = vadd.f32 %v1131_v30, %v1069_v32  ;;  %v1074_v58 = vmul.f32 %v1330_v33, %v1330_v33 }
 0x108   :  { %v636_v39 = vpop.f32.mrf.mxu0 }
 0x109   :  { %v1133_v41 = vadd.f32 %v1132_v38, %v1070_v35  ;;  %v1000_v42 = vadd.f32 %v1327_v23, %v999_v37  ;;  %v1072_v48 = vmul.f32 %v636_v39, %v636_v39 }
 0x10a   :  { %v1331_v43 = vpop.f32.mrf.mxu0 }
 0x10b   :  { %v1001_v47 = vadd.f32 %v1000_v42, %v636_v39  ;;  %v1134_v50 = vadd.f32 %v1133_v41, %v1071_v40  ;;  %v1075_v62 = vmul.f32 %v1331_v43, %v1331_v43  ;;  %v1086_v39 = vmul.f32 %v1599_v36, %v1599_v36 }
 0x10c   :  { %v639_v51 = vpop.f32.mrf.mxu0  ;;  %v1087_v41 = vmul.f32 %v1603_v57, %v1603_v57 }
 0x10d   :  { %v1135_v52 = vadd.f32 %v1134_v50, %v1072_v48  ;;  %v1002_v53 = vadd.f32 %v1001_v47, %v639_v51  ;;  %v1073_v55 = vmul.f32 %v639_v51, %v639_v51  ;;  %v1088_v48 = vmul.f32 %v1609_v24, %v1609_v24 }
 0x10f   :  { %v1003_v60 = vadd.f32 %v1330_v33, %v1002_v53  ;;  %v1136_v61 = vadd.f32 %v1135_v52, %v1073_v55  ;;  %v1084_v33 = vmul.f32 %v1601_v46, %v1601_v46  ;;  %v1089_v52 = vmul.f32 %v703_v45, %v703_v45 }
 0x111   :  { %v1004_v63 = vadd.f32 %v1331_v43, %v1003_v60  ;;  %v1137_v1 = vadd.f32 %v1136_v61, %v1074_v58 }
 0x113   :  { %v1138_v5 = vadd.f32 %v1137_v1, %v1075_v62  ;;  %v1005_v6 = vadd.f32 %v1004_v63, %v1585_v49  ;;  %v719_v49 = vpop.f32.mrf.mxu1 }
 0x115   :  { %v1006_v7 = vadd.f32 %v1005_v6, %v1589_v59  ;;  %v1139_v10 = vadd.f32 %v1138_v5, %v1076_v3  ;;  %v1080_v59 = vmul.f32 %v1593_v9, %v1593_v9  ;;  %v1354_v25 = vpop.f32.mrf.mxu1 }
 0x117   :  { %v1007_v13 = vadd.f32 %v1583_v44, %v1006_v7  ;;  %v1140_v15 = vadd.f32 %v1139_v10, %v1077_v8  ;;  %v1081_v44 = vmul.f32 %v1597_v27, %v1597_v27  ;;  %v732_v31 = vpop.f32.mrf.mxu1  ;;  %v1094_v7 = vmul.f32 %v1613_v56, %v1613_v56 }
 0x118   :  { %v1095_v10 = vmul.f32 %v1351_v11, %v1351_v11 }
 0x119   :  { %v1141_v17 = vadd.f32 %v1140_v15, %v1078_v12  ;;  %v1008_v19 = vadd.f32 %v1587_v54, %v1007_v13  ;;  %v1355_v38 = vpop.f32.mrf.mxu1 }
 0x11b   :  { %v1009_v20 = vadd.f32 %v1008_v19, %v1593_v9  ;;  %v1142_v21 = vadd.f32 %v1141_v17, %v1079_v16  ;;  %v735_v43 = vpop.f32.mrf.mxu1 }
 0x11d   :  { %v1143_v22 = vadd.f32 %v1142_v21, %v1080_v59  ;;  %v1010_v23 = vadd.f32 %v1009_v20, %v1597_v27  ;;  %v1358_v53 = vpop.f32.mrf.mxu1  ;;  %v1097_v20 = vmul.f32 %v735_v43, %v735_v43  ;;  %v1098_v21 = vmul.f32 %v1354_v25, %v1354_v25 }
 0x11f   :  { %v1011_v28 = vadd.f32 %v1591_v0, %v1010_v23  ;;  %v1144_v54 = vadd.f32 %v1143_v22, %v1081_v44  ;;  %v1085_v0 = vmul.f32 %v1605_v4, %v1605_v4  ;;  %v748_v62 = vpop.f32.mrf.mxu1  ;;  %v1099_v23 = vmul.f32 %v1355_v38, %v1355_v38 }
 0x121   :  { %v1145_v30 = vadd.f32 %v1144_v54, %v1082_v26  ;;  %v1012_v9 = vadd.f32 %v1595_v18, %v1011_v28  ;;  %v1359_v6 = vpop.f32.mrf.mxu1  ;;  %v1100_v54 = vmul.f32 %v748_v62, %v748_v62 }
 0x123   :  { %v1013_v32 = vadd.f32 %v1012_v9, %v1601_v46  ;;  %v1146_v27 = vadd.f32 %v1145_v30, %v1083_v29  ;;  %v751_v15 = vpop.f32.mrf.mxu1 }
 0x124   :  { %v1101_v9 = vmul.f32 %v751_v15, %v751_v15 }
 0x125   :  { %v1147_v35 = vadd.f32 %v1146_v27, %v1084_v33  ;;  %v1014_v37 = vadd.f32 %v1013_v32, %v1605_v4  ;;  %v1362_v59 = vpop.f32.mrf.mxu1 }
 0x127   :  { %v1015_v40 = vadd.f32 %v1599_v36, %v1014_v37  ;;  %v1148_v18 = vadd.f32 %v1147_v35, %v1085_v0  ;;  %v1090_v36 = vmul.f32 %v1607_v14, %v1607_v14  ;;  %v764_v28 = vpop.f32.mrf.mxu1  ;;  %v1103_v35 = vmul.f32 %v1359_v6, %v1359_v6 }
 0x129   :  { %v1149_v42 = vadd.f32 %v1148_v18, %v1086_v39  ;;  %v1016_v46 = vadd.f32 %v1603_v57, %v1015_v40  ;;  %v1091_v57 = vmul.f32 %v1611_v34, %v1611_v34  ;;  %v1363_v32 = vpop.f32.mrf.mxu1  ;;  %v1104_v40 = vmul.f32 %v764_v28, %v764_v28 }
 0x12b   :  { %v1017_v47 = vadd.f32 %v1016_v46, %v1609_v24  ;;  %v1150_v4 = vadd.f32 %v1149_v42, %v1087_v41  ;;  %v1092_v24 = vmul.f32 %v716_v2, %v716_v2  ;;  %v767_v39 = vpop.f32.mrf.mxu1  ;;  %v1106_v46 = vmul.f32 %v1362_v59, %v1362_v59 }
 0x12c   :  { %v1105_v42 = vmul.f32 %v767_v39, %v767_v39 }
 0x12d   :  { %v1151_v50 = vadd.f32 %v1150_v4, %v1088_v48  ;;  %v1018_v51 = vadd.f32 %v1017_v47, %v703_v45  ;;  %v1093_v45 = vmul.f32 %v719_v49, %v719_v49  ;;  %v1107_v48 = vmul.f32 %v1363_v32, %v1363_v32 }
 0x12f   :  { %v1019_v55 = vadd.f32 %v1607_v14, %v1018_v51  ;;  %v1152_v58 = vadd.f32 %v1151_v50, %v1089_v52 }
 0x131   :  { %v1153_v60 = vadd.f32 %v1152_v58, %v1090_v36  ;;  %v1020_v61 = vadd.f32 %v1611_v34, %v1019_v55  ;;  %v1096_v34 = vmul.f32 %v732_v31, %v732_v31 }
 0x133   :  { %v1021_v63 = vadd.f32 %v1020_v61, %v716_v2  ;;  %v1154_v1 = vadd.f32 %v1153_v60, %v1091_v57 }
 0x135   :  { %v1155_v3 = vadd.f32 %v1154_v1, %v1092_v24  ;;  %v1022_v5 = vadd.f32 %v1021_v63, %v719_v49 }
 0x137   :  { %v1023_v14 = vadd.f32 %v1613_v56, %v1022_v5  ;;  %v1156_v8 = vadd.f32 %v1155_v3, %v1093_v45 }
 0x139   :  { %v1157_v12 = vadd.f32 %v1156_v8, %v1094_v7  ;;  %v1024_v13 = vadd.f32 %v1351_v11, %v1023_v14 }
 0x13b   :  { %v1025_v16 = vadd.f32 %v1024_v13, %v732_v31  ;;  %v1158_v17 = vadd.f32 %v1157_v12, %v1095_v10  ;;  %v1102_v31 = vmul.f32 %v1358_v53, %v1358_v53 }
 0x13d   :  { %v1159_v19 = vadd.f32 %v1158_v17, %v1096_v34  ;;  %v1026_v2 = vadd.f32 %v1025_v16, %v735_v43 }
 0x13f   :  { %v1027_v49 = vadd.f32 %v1354_v25, %v1026_v2  ;;  %v1160_v22 = vadd.f32 %v1159_v19, %v1097_v20 }
 0x141   :  { %v1161_v44 = vadd.f32 %v1160_v22, %v1098_v21  ;;  %v1028_v26 = vadd.f32 %v1355_v38, %v1027_v49 }
 0x143   :  { %v1029_v56 = vadd.f32 %v1028_v26, %v748_v62  ;;  %v1162_v29 = vadd.f32 %v1161_v44, %v1099_v23 }
 0x145   :  { %v1163_v30 = vadd.f32 %v1162_v29, %v1100_v54  ;;  %v1030_v11 = vadd.f32 %v1029_v56, %v751_v15 }
 0x147   :  { %v1031_v33 = vadd.f32 %v1358_v53, %v1030_v11  ;;  %v1164_v27 = vadd.f32 %v1163_v30, %v1101_v9 }
 0x149   :  { %v1165_v37 = vadd.f32 %v1164_v27, %v1102_v31  ;;  %v1032_v0 = vadd.f32 %v1359_v6, %v1031_v33 }
 0x14b   :  { %v1033_v25 = vadd.f32 %v1032_v0, %v764_v28  ;;  %v1166_v18 = vadd.f32 %v1165_v37, %v1103_v35 }
 0x14d   :  { %v1167_v41 = vadd.f32 %v1166_v18, %v1104_v40  ;;  %v1034_v38 = vadd.f32 %v1033_v25, %v767_v39 }
 0x14f   :  { %v1035_v43 = vadd.f32 %v1362_v59, %v1034_v38  ;;  %v1168_v47 = vadd.f32 %v1167_v41, %v1105_v42 }
 0x151   :  { %v1036_v4 = vadd.f32 %v1363_v32, %v1035_v43  ;;  %v1169_v50 = vadd.f32 %v1168_v47, %v1106_v46 }
 0x153   :  { %v1037_v51 = vrot.slane %v1036_v4, 4  ;;  %v1170_v52 = vadd.f32 %v1169_v50, %v1107_v48 }
 0x155   :  { %v1038_v53 = vadd.f32 %v1037_v51, %v1036_v4  ;;  %v1171_v36 = vrot.slane %v1170_v52, 4 }
 0x157   :  { %v1039_v55 = vrot.slane %v1038_v53, 2  ;;  %v1172_v58 = vadd.f32 %v1171_v36, %v1170_v52 }
 0x159   :  { %v1040_v57 = vadd.f32 %v1039_v55, %v1038_v53  ;;  %v1173_v60 = vrot.slane %v1172_v58, 2 }
 0x15b   :  { %v1041_v61 = vrot.slane %v1040_v57, 1  ;;  %v1174_v62 = vadd.f32 %v1173_v60, %v1172_v58 }
 0x15d   :  { %v1042_v63 = vadd.f32 %v1041_v61, %v1040_v57  ;;  %v1175_v24 = vrot.slane %v1174_v62, 1 }
 0x15f   :  { %1043 = vst [vmem:[#allocation3] sm:$0x1] %v1042_v63  ;;  %v1176_v1 = vadd.f32 %v1175_v24, %v1174_v62 }
 0x161   :  { %1177 = vst [vmem:[#allocation3 + $0x1] sm:$0x1] %v1176_v1 }
 0x162   :  { %1419 = shalt.err (!%p1416_p4)
}
 0x163   :  { %1187 = dma.vmem_to_hbm [thread:$0]  %s1185_s1, 32, %s1668_s2, [#allocation4]  }
 0x164   :  { %1428 = dma.done.wait [#allocation4], 32  }
 0x165   :  { %1429 = vsyncadd [#allocation4], 4294967264 }
 0x166   :  { %1191 = vsyncpa [#allocation4], 1 }

</bundles_post_ra>
